<compile_context>
chip_gen: v7x
topology: tpu7x:2x2x1
jax: 0.10.0
libtpu: 0.0.40
codegen_flags: <defaults>
</compile_context>

<pallas_src>
import functools

import jax
import jax.numpy as jnp
from jax.experimental import pallas as pl
from jax.experimental.pallas import tpu as pltpu


def _round_up(x, m):
    return ((int(x) + m - 1) // m) * m


def _pl_kernel(y_ref, loss_ref, gt_ref, *, threshold, num_classes, batch, tile_rows):
    i = pl.program_id(0)
    y = y_ref[...].astype(jnp.float32)                          # (TB, C)

    # Partial last tile: rows >= batch hold clipped/stale data.  Zero them
    # BEFORE exp so NaN/Inf can never leak into the outputs.
    row = i * tile_rows + jax.lax.broadcasted_iota(jnp.int32, (tile_rows, 1), 0)
    valid = row < batch                                         # (TB, 1) bool
    y = jnp.where(valid, y, 0.0)

    # Numerically stable log-sum-exp pieces (class axis = lanes).
    m = jnp.max(y, axis=1, keepdims=True)                       # (TB, 1)
    shifted = y - m
    exps = jnp.exp(shifted)                                     # EUP
    sumexp = jnp.sum(exps, axis=1, keepdims=True)               # S >= 1
    dot = jnp.sum(exps * shifted, axis=1, keepdims=True)
    log_sumexp = jnp.log(sumexp)
    entropy = log_sumexp - dot / sumexp                         # -(p*logp).sum

    # gt_mask = (max_prob > th) = (1/S > th) = (th*S < 1); S > 0 always.
    gt = (threshold * sumexp < 1.0).astype(jnp.float32)
    per_sample = gt * (float(num_classes) * log_sumexp) + (1.0 - gt) * entropy

    validf = valid.astype(jnp.float32)
    per_sample = per_sample * validf
    gt = gt * validf

    # Relayout the two (TB,1) per-sample columns into lane-dense (1,TB) rows
    # with ONE tile-aligned (TB,128) -> (128,TB) transpose: sublane 0 carries
    # the loss, sublane 8 carries gt (both slice starts are 8-aligned).
    lane = jax.lax.broadcasted_iota(jnp.int32, (tile_rows, 128), 1)
    staged = jnp.where(lane == 0, per_sample, jnp.where(lane == 8, gt, 0.0))
    t = jnp.transpose(staged)                                   # (128, TB)
    loss_ref[...] = t[0:1, :]
    gt_ref[...] = t[8:9, :]


def _choose_tile_rows(B, C, itemsize):
    """Batch-tile height TB.

    Accounts for the lane-padded VMEM footprint (C rounds up to 128 lanes):
      per row ~ 2 double-buffered y copies + ~3 f32 temporaries + transpose
      staging.  Budgeted to ~14 MiB of accounted buffers, well under the
      explicit 32 MiB vmem limit passed to the compiler (OK on v5e/v6e/v7x).
    Also capped at ~B/2 so the grid has >= 2 tiles (both v7x TensorCores busy)
    whenever B > 8.
    """
    cpad = _round_up(max(int(C), 1), 128)
    per_row = 2 * itemsize * cpad + 3 * 4 * cpad + 2 * 4 * 128 + 16
    budget = 14 * 1024 * 1024
    tb = max(8, budget // per_row)
    tb = min(tb, _round_up(pl.cdiv(int(B), 2), 8))
    tb = (tb // 128) * 128 if tb >= 128 else (tb // 8) * 8
    return max(8, int(tb))


def pl_loss(y, mask, *, threshold, num_classes):
    """Pallas implementation of PL.forward.  Returns (loss, gt_mask)."""
    B, C = y.shape
    assert C == num_classes

    itemsize = jnp.dtype(y.dtype).itemsize
    TB = _choose_tile_rows(B, C, itemsize)
    num_tiles = pl.cdiv(B, TB)

    kernel = functools.partial(
        _pl_kernel,
        threshold=float(threshold),
        num_classes=int(num_classes),
        batch=int(B),
        tile_rows=int(TB),
    )

    cost = pl.CostEstimate(
        flops=8 * B * C,
        transcendentals=B * C + 2 * B,
        bytes_accessed=B * C * itemsize + 2 * num_tiles * TB * 4,
    )

    loss_rows, gt_rows = pl.pallas_call(
        kernel,
        out_shape=(
            jax.ShapeDtypeStruct((num_tiles, TB), jnp.float32),
            jax.ShapeDtypeStruct((num_tiles, TB), jnp.float32),
        ),
        grid=(num_tiles,),
        in_specs=[pl.BlockSpec((TB, C), lambda i: (i, 0))],
        out_specs=(
            pl.BlockSpec((1, TB), lambda i: (i, 0)),
            pl.BlockSpec((1, TB), lambda i: (i, 0)),
        ),
        compiler_params=pltpu.CompilerParams(
            dimension_semantics=("parallel",),
            vmem_limit_bytes=32 * 1024 * 1024,
        ),
        cost_estimate=cost,
    )(y)

    # Finish the masked mean in the wrapper (mask never enters the kernel);
    # these are O(B) float ops, negligible next to the y stream.
    per_sample = loss_rows.reshape(-1)[:B]
    gt_mask = gt_rows.reshape(-1)[:B]
    loss = jnp.sum(per_sample * mask.astype(jnp.float32)) / float(B)
    return loss, gt_mask


def _reference(y, mask, threshold, num_classes):
    """Pure-JAX reference (mirrors the PyTorch module)."""
    y = y.astype(jnp.float32)
    probs = jax.nn.softmax(y, axis=1)
    onehot = jax.nn.one_hot(jnp.argmax(probs, axis=1), num_classes, dtype=jnp.float32)
    gt_mask = jnp.max((probs > threshold).astype(jnp.float32), axis=1)
    lt_mask = 1.0 - gt_mask
    p_target = gt_mask[:, None] * num_classes * onehot + lt_mask[:, None] * probs
    logp = jax.nn.log_softmax(y, axis=1)
    loss = jnp.mean(-(p_target * logp).sum(axis=1) * mask)
    return loss, gt_mask


if __name__ == "__main__":
    key = jax.random.PRNGKey(0)
    keys = jax.random.split(key, 6)
    threshold = 0.2

    # Case 1: small, tile-aligned batch.
    B, C = 8, 16
    y = jax.random.normal(keys[0], (B, C), dtype=jnp.float32) * 3.0
    mask = (jax.random.uniform(keys[1], (B,)) > 0.3).astype(jnp.float32)
    loss, gt = pl_loss(y, mask, threshold=threshold, num_classes=C)
    jax.block_until_ready((loss, gt))
    ref_loss, ref_gt = _reference(y, mask, threshold, C)
    assert jnp.allclose(loss, ref_loss, atol=1e-5, rtol=1e-5), (loss, ref_loss)
    assert jnp.allclose(gt, ref_gt), (gt, ref_gt)

    # Case 2: batch not a multiple of the tile (exercises in-kernel validity mask).
    B2, C2 = 5, 16
    y2 = jax.random.normal(keys[2], (B2, C2), dtype=jnp.float32) * 3.0
    mask2 = (jax.random.uniform(keys[3], (B2,)) > 0.3).astype(jnp.float32)
    loss2, gt2 = pl_loss(y2, mask2, threshold=threshold, num_classes=C2)
    jax.block_until_ready((loss2, gt2))
    ref_loss2, ref_gt2 = _reference(y2, mask2, threshold, C2)
    assert jnp.allclose(loss2, ref_loss2, atol=1e-5, rtol=1e-5), (loss2, ref_loss2)
    assert jnp.allclose(gt2, ref_gt2), (gt2, ref_gt2)

    # Case 3: multi-tile grid with a partial last tile and non-power-of-2 C.
    B3, C3 = 300, 24
    y3 = jax.random.normal(keys[4], (B3, C3), dtype=jnp.float32) * 3.0
    mask3 = (jax.random.uniform(keys[5], (B3,)) > 0.3).astype(jnp.float32)
    loss3, gt3 = pl_loss(y3, mask3, threshold=0.15, num_classes=C3)
    jax.block_until_ready((loss3, gt3))
    ref_loss3, ref_gt3 = _reference(y3, mask3, 0.15, C3)
    assert jnp.allclose(loss3, ref_loss3, atol=1e-5, rtol=1e-5), (loss3, ref_loss3)
    assert jnp.allclose(gt3, ref_gt3), (gt3, ref_gt3)

    print("KERNEL_OK")
</pallas_src>

<mosaic_0001>
module attributes {stable_mosaic.version = 11 : i64} {
  func.func @_pl_kernel(%arg0: i32, %arg1: memref<8x16xf32, #tpu.memory_space<vmem>>, %arg2: memref<1x8xf32, #tpu.memory_space<vmem>>, %arg3: memref<1x8xf32, #tpu.memory_space<vmem>>) attributes {dimension_semantics = [#tpu.dimension_semantics<parallel>], iteration_bounds = array<i64: 1>, scalar_prefetch = 0 : i64, scratch_operands = 0 : i64, tpu.core_type = #tpu.core_type<tc>, window_params = [{transform_indices = @transform_0, window_bounds = array<i64: 8, 16>}, {transform_indices = @transform_1, window_bounds = array<i64: 1, 8>}, {transform_indices = @transform_2, window_bounds = array<i64: 1, 8>}]} {
    %c0 = arith.constant 0 : index
    %c0_0 = arith.constant 0 : index
    %0 = vector.load %arg1[%c0, %c0_0] : memref<8x16xf32, #tpu.memory_space<vmem>>, vector<8x16xf32>
    %c8_i32 = arith.constant 8 : i32
    %1 = arith.muli %arg0, %c8_i32 : i32
    %2 = tpu.iota {dimensions = array<i32: 0>} : vector<8x1xi32>
    %3 = vector.broadcast %1 : i32 to vector<8x1xi32>
    %4 = arith.addi %3, %2 : vector<8x1xi32>
    %c8_i32_1 = arith.constant 8 : i32
    %5 = vector.broadcast %c8_i32_1 : i32 to vector<8x1xi32>
    %6 = arith.cmpi slt, %4, %5 : vector<8x1xi32>
    %cst = arith.constant 0.000000e+00 : f32
    %7 = vector.shape_cast %6 : vector<8x1xi1> to vector<8x1xi1>
    %8 = vector.broadcast %7 : vector<8x1xi1> to vector<8x16xi1>
    %9 = vector.broadcast %cst : f32 to vector<8x16xf32>
    %10 = arith.select %8, %0, %9 : vector<8x16xi1>, vector<8x16xf32>
    %cst_2 = arith.constant dense<0xFF800000> : vector<8xf32>
    %11 = vector.multi_reduction <maximumf>, %10, %cst_2 [1] : vector<8x16xf32> to vector<8xf32>
    %12 = vector.shape_cast %11 : vector<8xf32> to vector<8x1xf32>
    %13 = vector.broadcast %12 : vector<8x1xf32> to vector<8x16xf32>
    %14 = arith.subf %10, %13 : vector<8x16xf32>
    %15 = math.exp %14 : vector<8x16xf32>
    %cst_3 = arith.constant dense<0.000000e+00> : vector<8xf32>
    %16 = vector.multi_reduction <add>, %15, %cst_3 [1] : vector<8x16xf32> to vector<8xf32>
    %17 = vector.shape_cast %16 : vector<8xf32> to vector<8x1xf32>
    %18 = arith.mulf %15, %14 : vector<8x16xf32>
    %cst_4 = arith.constant dense<0.000000e+00> : vector<8xf32>
    %19 = vector.multi_reduction <add>, %18, %cst_4 [1] : vector<8x16xf32> to vector<8xf32>
    %20 = vector.shape_cast %19 : vector<8xf32> to vector<8x1xf32>
    %21 = math.log %17 : vector<8x1xf32>
    %22 = arith.divf %20, %17 : vector<8x1xf32>
    %23 = arith.subf %21, %22 : vector<8x1xf32>
    %cst_5 = arith.constant 2.000000e-01 : f32
    %24 = vector.broadcast %cst_5 : f32 to vector<8x1xf32>
    %25 = arith.mulf %24, %17 : vector<8x1xf32>
    %cst_6 = arith.constant 1.000000e+00 : f32
    %26 = vector.broadcast %cst_6 : f32 to vector<8x1xf32>
    %27 = arith.cmpf olt, %25, %26 : vector<8x1xf32>
    %28 = arith.extui %27 : vector<8x1xi1> to vector<8x1xi32>
    %29 = arith.sitofp %28 : vector<8x1xi32> to vector<8x1xf32>
    %cst_7 = arith.constant 1.600000e+01 : f32
    %30 = vector.broadcast %cst_7 : f32 to vector<8x1xf32>
    %31 = arith.mulf %30, %21 : vector<8x1xf32>
    %32 = arith.mulf %29, %31 : vector<8x1xf32>
    %cst_8 = arith.constant 1.000000e+00 : f32
    %33 = vector.broadcast %cst_8 : f32 to vector<8x1xf32>
    %34 = arith.subf %33, %29 : vector<8x1xf32>
    %35 = arith.mulf %34, %23 : vector<8x1xf32>
    %36 = arith.addf %32, %35 : vector<8x1xf32>
    %37 = arith.extui %6 : vector<8x1xi1> to vector<8x1xi32>
    %38 = arith.sitofp %37 : vector<8x1xi32> to vector<8x1xf32>
    %39 = arith.mulf %36, %38 : vector<8x1xf32>
    %40 = arith.mulf %29, %38 : vector<8x1xf32>
    %41 = tpu.iota {dimensions = array<i32: 1>} : vector<8x128xi32>
    %c0_i32 = arith.constant 0 : i32
    %42 = vector.broadcast %c0_i32 : i32 to vector<8x128xi32>
    %43 = arith.cmpi eq, %41, %42 : vector<8x128xi32>
    %c8_i32_9 = arith.constant 8 : i32
    %44 = vector.broadcast %c8_i32_9 : i32 to vector<8x128xi32>
    %45 = arith.cmpi eq, %41, %44 : vector<8x128xi32>
    %cst_10 = arith.constant 0.000000e+00 : f32
    %46 = vector.shape_cast %40 : vector<8x1xf32> to vector<8x1xf32>
    %47 = vector.broadcast %46 : vector<8x1xf32> to vector<8x128xf32>
    %48 = vector.broadcast %cst_10 : f32 to vector<8x128xf32>
    %49 = arith.select %45, %47, %48 : vector<8x128xi1>, vector<8x128xf32>
    %50 = vector.shape_cast %39 : vector<8x1xf32> to vector<8x1xf32>
    %51 = vector.broadcast %50 : vector<8x1xf32> to vector<8x128xf32>
    %52 = arith.select %43, %51, %49 : vector<8x128xi1>, vector<8x128xf32>
    %53 = tpu.transpose %52, [1, 0] : vector<8x128xf32> -> vector<128x8xf32>
    %54 = vector.extract_strided_slice %53 {offsets = [0, 0], sizes = [1, 8], strides = [1, 1]} : vector<128x8xf32> to vector<1x8xf32>
    %c0_11 = arith.constant 0 : index
    %c0_12 = arith.constant 0 : index
    %55 = vector.load %arg2[%c0_11, %c0_12] : memref<1x8xf32, #tpu.memory_space<vmem>>, vector<1x8xf32>
    tpu.vector_store %arg2[%c0_11, %c0_12], %54 {strides = array<i32>} : memref<1x8xf32, #tpu.memory_space<vmem>>, vector<1x8xf32>,
    %56 = vector.extract_strided_slice %53 {offsets = [8, 0], sizes = [1, 8], strides = [1, 1]} : vector<128x8xf32> to vector<1x8xf32>
    %c0_13 = arith.constant 0 : index
    %c0_14 = arith.constant 0 : index
    %57 = vector.load %arg3[%c0_13, %c0_14] : memref<1x8xf32, #tpu.memory_space<vmem>>, vector<1x8xf32>
    tpu.vector_store %arg3[%c0_13, %c0_14], %56 {strides = array<i32>} : memref<1x8xf32, #tpu.memory_space<vmem>>, vector<1x8xf32>,
    return
  }
  func.func @transform_0(%arg0: i32) -> (i32, i32) {
    %c0_i32 = arith.constant 0 : i32
    %c0_i32_0 = arith.constant 0 : i32
    return %arg0, %c0_i32 : i32, i32
  }
  func.func @transform_1(%arg0: i32) -> (i32, i32) {
    %c0_i32 = arith.constant 0 : i32
    %c0_i32_0 = arith.constant 0 : i32
    return %arg0, %c0_i32 : i32, i32
  }
  func.func @transform_2(%arg0: i32) -> (i32, i32) {
    %c0_i32 = arith.constant 0 : i32
    %c0_i32_0 = arith.constant 0 : i32
    return %arg0, %c0_i32 : i32, i32
  }
}

</mosaic_0001>

<bundles_post_ra>
// kernel: tpu_custom_call.1
= control target key start
LH: loop header
LB: loop body
LE: loop exit
PB: predicated region body
PF: predicated region fallthrough
CT: control target
= control target key end

     0   :  { %8 = vsyncpa [#allocation3], 0  ;;  %s275_s0 = inlined_call_operand.hbm [shape: f32[8,16], index: 0, kind: input, shape index: {}]   ;;  %s276_s1 = inlined_call_operand.hbm [shape: f32[1,8], index: 1, kind: output, shape index: {0}]   ;;  %s277_s2 = inlined_call_operand.hbm [shape: f32[1,8], index: 2, kind: output, shape index: {1}]  }
   0x1   :  { %9 = vsyncpa [#allocation4], 0 }
   0x2   :  { %10 = vsyncpa [#allocation7], 0  ;;  %s218_s9 = smov [#allocation2]   ;;  %s146_s13 = scalar_lea.hbm %s275_s0, 128 }
   0x3   :  { %s17_s10 = sshll.u32 %s218_s9, 4  ;;  %p147_p0 = scmp.ne.s32.totalorder %s275_s0, %s146_s13  ;;  %s18_s10 = int_to_ptr.vmem [resolvable:$true] %s17_s10 }
   0x4   :  { %p150_p1 = scmp.lt.u32.totalorder %s146_s13, %s275_s0 }
   0x6   :  { %p152_p2 = pnand %p150_p1, %p147_p0 }
   0x8   :  { %155 = shalt.err (!%p152_p2)
}
   0x9   :  { %s156_s18 = scalar_lea.vmem %s18_s10, 128  ;;  %p161_p4 = scmp.lt.s32.totalorder %s18_s10, %s18_s10 }
   0xa   :  { %p157_p3 = scmp.ne.s32.totalorder %s18_s10, %s156_s18  ;;  %p162_p5 = scmp.lt.s32.totalorder %s156_s18, %s156_s18 }
   0xc   :  { %p163_p6 = por %p162_p5, %p161_p4 }
   0xe   :  { %p164_p7 = pnand %p163_p6, %p157_p3 }
  0x10   :  { %167 = shalt.err (!%p164_p7)
}
  0x11   :  { %20 = dma.hbm_to_vmem [thread:$0]  %s275_s0, 128, %s18_s10, [#allocation3]  }
  0x12   :  { %212 = dma.done.wait [#allocation3], 128  }
  0x13   :  { %213 = vsyncadd [#allocation3], 4294967168  ;;  %vm34_vm0 = vcmask 130048   ;;  %v24_v0 = vld [vmem:[#allocation2] sm:$0xff]  ;;  %v65_v11 = vlaneseq  ;;  %v219_v14 = vmov 0.0   ;;  %s220_s0 = smov [#allocation5]  }
  0x14   :  { %v35_v1 = vsel %vm34_vm0, %v24_v0, -inf  ;;  %s112_s21 = sshll.u32 %s220_s0, 4  ;;  %vm103_vm4 = vcmask 57344   ;;  %s221_s22 = smov [#allocation6]   ;;  %s113_s21 = int_to_ptr.vmem [resolvable:$true] %s112_s21 }
  0x15   :  { %36 = vmax.xlane.f32.xlu0 %v35_v1  ;;  %v66_v19 = vand.u32 127, %v65_v11  ;;  %s122_s23 = sshll.u32 %s221_s22, 4  ;;  %s168_s24 = scalar_lea.vmem %s113_s21, 16  ;;  %s123_s23 = int_to_ptr.vmem [resolvable:$true] %s122_s23 }
  0x16   :  { %p169_p8 = scmp.ne.s32.totalorder %s113_s21, %s168_s24  ;;  %s172_s25 = scalar_lea.vmem %s113_s21, 32 }
  0x17   :  { %vm68_vm2 = vcmp.eq.s32.totalorder %v66_v19, 8  ;;  %vm67_vm3 = vcmp.eq.s32.totalorder %v66_v19, 0  ;;  %p173_p9 = scmp.lt.s32.totalorder %s113_s21, %s113_s21  ;;  %p174_p10 = scmp.lt.s32.totalorder %s172_s25, %s168_s24 }
  0x19   :  { %p175_p11 = por %p174_p10, %p173_p9 }
  0x1b   :  { %p176_p12 = pnand %p175_p11, %p169_p8 }
  0xa2   :  { %v37_v2 = vpop.xlane.xlu0 %36 }
  0xa3   :  { %v38_v3 = vsub.f32 %v24_v0, %v37_v2 }
  0xa5   :  { %v39_v4 = vmul.f32 1.442695, %v38_v3 }
  0xa7   :  { %140 = vpow2.f32 %v39_v4 }
  0xb1   :  { %v141_v5 = vpop.eup %140 }
  0xb2   :  { %v41_v6 = vsel %vm34_vm0, %v141_v5, 0.0  ;;  %v44_v7 = vmul.f32 %v141_v5, %v38_v3 }
  0xb3   :  { %42 = vadd.xlane.f32.xlu0 %v41_v6 }
  0xb4   :  { %v45_v8 = vsel %vm34_vm0, %v44_v7, 0.0 }
  0xb5   :  { %46 = vadd.xlane.f32.xlu1 %v45_v8 }
 0x140   :  { %v43_v9 = vpop.xlane.xlu0 %42 }
 0x141   :  { %142 = vlog2.f32 %v43_v9  ;;  %v53_v10 = vmul.f32 0.2, %v43_v9 }
 0x142   :  { %144 = vrcp.f32 %v43_v9  ;;  %v47_v16 = vpop.xlane.xlu1 %46 }
 0x143   :  { %vm54_vm1 = vcmp.lt.f32.partialorder %v53_v10, 1.0 }
 0x144   :  { %v135_v15 = vsel %vm54_vm1, 1.0, %v219_v14 }
 0x145   :  { %v59_v21 = vsub.f32 1.0, %v135_v15  ;;  %v69_v26 = vsel %vm68_vm2, %v135_v15, 0.0 }
 0x14b   :  { %v143_v12 = vpop.eup %142 }
 0x14c   :  { %v145_v13 = vpop.eup %144  ;;  %v49_v17 = vmul.f32 0.6931472, %v143_v12 }
 0x14d   :  { %v51_v18 = vmul.f32 %v145_v13, %v47_v16 }
 0x14e   :  { %v57_v20 = vmul.f32 16.0, %v49_v17 }
 0x14f   :  { %v52_v22 = vsub.f32 %v49_v17, %v51_v18 }
 0x150   :  { %v58_v23 = vmul.f32 %v135_v15, %v57_v20 }
 0x151   :  { %v60_v24 = vmul.f32 %v59_v21, %v52_v22 }
 0x153   :  { %v61_v25 = vadd.f32 %v60_v24, %v58_v23 }
 0x155   :  { %v70_v27 = vsel %vm67_vm3, %v61_v25, %v69_v26 }
 0x156   :  { %71 = vxpose.xlu1.b32.start.end [1/1] (short) (narrow) %v70_v27, 16 }
 0x1d6   :  { %v87_v28 = vpop.trf.xlu1 }
 0x1d7   :  { %104 = vst.msk [vmem:[#allocation5] sm:$0x1] %vm103_vm4, %v87_v28 }
 0x1d8   :  { %179 = shalt.err (!%p176_p12)
}
 0x1d9   :  { %s180_s28 = scalar_lea.hbm %s276_s1, 16 }
 0x1da   :  { %p181_p13 = scmp.ne.s32.totalorder %s276_s1, %s180_s28  ;;  %p184_p0 = scmp.lt.u32.totalorder %s180_s28, %s276_s1 }
 0x1dc   :  { %p186_p1 = pnand %p184_p0, %p181_p13 }
 0x1de   :  { %189 = shalt.err (!%p186_p1)
}
 0x1df   :  { %115 = dma.vmem_to_hbm [thread:$0]  %s113_s21, 16, %s276_s1, [#allocation4]   ;;  %v88_v29 = vpop.trf.xlu1 }
 0x1e0   :  { %105 = vst.msk [vmem:[#allocation6] sm:$0x1] %vm103_vm4, %v88_v29  ;;  %s190_s7 = scalar_lea.vmem %s123_s23, 16  ;;  %s194_s8 = scalar_lea.vmem %s123_s23, 32 }
 0x1e1   :  { %p191_p2 = scmp.ne.s32.totalorder %s123_s23, %s190_s7  ;;  %p195_p3 = scmp.lt.s32.totalorder %s123_s23, %s123_s23 }
 0x1e2   :  { %p196_p4 = scmp.lt.s32.totalorder %s194_s8, %s190_s7 }
 0x1e4   :  { %p197_p5 = por %p196_p4, %p195_p3 }
 0x1e6   :  { %p198_p6 = pnand %p197_p5, %p191_p2 }
 0x1e8   :  { %201 = shalt.err (!%p198_p6)
}
 0x1e9   :  { %s202_s11 = scalar_lea.hbm %s277_s2, 16 }
 0x1ea   :  { %p203_p7 = scmp.ne.s32.totalorder %s277_s2, %s202_s11  ;;  %p206_p8 = scmp.lt.u32.totalorder %s202_s11, %s277_s2 }
 0x1ec   :  { %p208_p9 = pnand %p206_p8, %p203_p7 }
 0x1ee   :  { %211 = shalt.err (!%p208_p9)
}
 0x1ef   :  { %125 = dma.vmem_to_hbm [thread:$0]  %s123_s23, 16, %s277_s2, [#allocation7]  }
 0x1f0   :  { %214 = dma.done.wait [#allocation4], 16  }
 0x1f1   :  { %215 = vsyncadd [#allocation4], 4294967280 }
 0x1f2   :  { %216 = dma.done.wait [#allocation7], 16  }
 0x1f3   :  { %217 = vsyncadd [#allocation7], 4294967280 }
 0x1f4   :  { %132 = vsyncpa [#allocation3], 1 }
 0x1f5   :  { %133 = vsyncpa [#allocation4], 1 }
 0x1f6   :  { %134 = vsyncpa [#allocation7], 1 }

</bundles_post_ra>
